<compile_context>
chip_gen: v6e
topology: v6e:2x2x1
jax: 0.10.0
libtpu: 0.0.40
codegen_flags: <defaults>
</compile_context>

<pallas_src>
import functools

import jax
import jax.numpy as jnp
from jax.experimental import pallas as pl
from jax.experimental.pallas import tpu as pltpu

_LANES = 128
_SUBLANES = 8
_TILE_ROWS = 2048  # (2048, 128) f32 block = 1 MiB per input per buffer


def _stable_bce(x, y):
    # max(x,0) - x*y + log1p(exp(-|x|))
    return jnp.maximum(x, 0.0) - x * y + jnp.log1p(jnp.exp(-jnp.abs(x)))


def _bce_sum_kernel(x_ref, y_ref, out_ref, acc_ref, *, rows_total, tile_rows):
    i = pl.program_id(0)
    nblocks = pl.num_programs(0)

    @pl.when(i == 0)
    def _():
        acc_ref[...] = jnp.zeros_like(acc_ref)

    x = x_ref[...].astype(jnp.float32)
    y = y_ref[...].astype(jnp.float32)
    loss = _stable_bce(x, y)

    # Hot path: all rows valid, no masking, pure VPU adds into (8,128) acc.
    @pl.when(i < nblocks - 1)
    def _():
        acc_ref[...] += loss.reshape(
            tile_rows // _SUBLANES, _SUBLANES, _LANES).sum(axis=0)

    # Last (possibly partial) block: mask invalid rows, accumulate, finalize.
    @pl.when(i == nblocks - 1)
    def _():
        valid_rows = rows_total - i * tile_rows
        row_idx = jax.lax.broadcasted_iota(jnp.int32, loss.shape, 0)
        masked = jnp.where(row_idx < valid_rows, loss, 0.0)
        acc_ref[...] += masked.reshape(
            tile_rows // _SUBLANES, _SUBLANES, _LANES).sum(axis=0)
        out_ref[0, 0] = jnp.sum(acc_ref[...])


def bce_with_logits_loss(output: jax.Array, target: jax.Array) -> jax.Array:
    """Mean BCE-with-logits loss over all elements (weight=None)."""
    assert output.shape == target.shape
    n = output.size

    x_flat = output.reshape(-1)
    y_flat = target.reshape(-1)

    rows = n // _LANES
    n_main = rows * _LANES
    tail = n - n_main

    # Tiny ragged tail (< 128 elements) handled directly in the wrapper.
    if tail > 0:
        xt = x_flat[n_main:].astype(jnp.float32)
        yt = y_flat[n_main:].astype(jnp.float32)
        tail_sum = jnp.sum(_stable_bce(xt, yt))
    else:
        tail_sum = jnp.float32(0.0)

    if rows == 0:
        return tail_sum / jnp.float32(n)

    # Lane-dense (rows, 128) view; a free reshape when n % 128 == 0.
    x_main = (x_flat if tail == 0 else x_flat[:n_main]).reshape(rows, _LANES)
    y_main = (y_flat if tail == 0 else y_flat[:n_main]).reshape(rows, _LANES)

    nblocks = pl.cdiv(rows, _TILE_ROWS)
    kernel = functools.partial(
        _bce_sum_kernel, rows_total=rows, tile_rows=_TILE_ROWS)

    main_sum = pl.pallas_call(
        kernel,
        out_shape=jax.ShapeDtypeStruct((1, 1), jnp.float32),
        grid_spec=pltpu.PrefetchScalarGridSpec(
            num_scalar_prefetch=0,
            grid=(nblocks,),
            in_specs=[
                pl.BlockSpec((_TILE_ROWS, _LANES), lambda i: (i, 0)),
                pl.BlockSpec((_TILE_ROWS, _LANES), lambda i: (i, 0)),
            ],
            out_specs=pl.BlockSpec(memory_space=pltpu.MemorySpace.SMEM),
            scratch_shapes=[pltpu.VMEM((_SUBLANES, _LANES), jnp.float32)],
        ),
        compiler_params=pltpu.CompilerParams(
            dimension_semantics=("arbitrary",)),  # reduction axis
    )(x_main, y_main)[0, 0]

    return (main_sum + tail_sum) / jnp.float32(n)


def _reference(output, target):
    x = output.astype(jnp.float32)
    y = target.astype(jnp.float32)
    return jnp.mean(_stable_bce(x, y))


if __name__ == "__main__":
    key = jax.random.PRNGKey(0)
    k1, k2 = jax.random.split(key)

    # NCHW-shaped logits and {0,1} targets, as the PyTorch module would see.
    shape = (2, 4, 16, 16)
    logits = jax.random.normal(k1, shape, dtype=jnp.float32) * 2.0
    targets = (jax.random.uniform(k2, shape) > 0.5).astype(jnp.float32)

    loss = bce_with_logits_loss(logits, targets)
    jax.block_until_ready(loss)
    ref = _reference(logits, targets)
    assert jnp.allclose(loss, ref, atol=1e-5, rtol=1e-5), (loss, ref)

    # Extra shape with element count not a multiple of 128 (exercises the
    # ragged-row mask in the kernel and the flat tail in the wrapper).
    k3, k4 = jax.random.split(k2)
    shape2 = (4, 3, 17, 19)
    logits2 = jax.random.normal(k3, shape2, dtype=jnp.float32) * 2.0
    targets2 = (jax.random.uniform(k4, shape2) > 0.5).astype(jnp.float32)
    loss2 = bce_with_logits_loss(logits2, targets2)
    jax.block_until_ready(loss2)
    ref2 = _reference(logits2, targets2)
    assert jnp.allclose(loss2, ref2, atol=1e-5, rtol=1e-5), (loss2, ref2)

    print("KERNEL_OK")
</pallas_src>

<mosaic_0001>
module attributes {stable_mosaic.version = 11 : i64} {
  func.func @_bce_sum_kernel(%arg0: i32, %arg1: memref<2048x128xf32, #tpu.memory_space<vmem>>, %arg2: memref<2048x128xf32, #tpu.memory_space<vmem>>, %arg3: memref<1x1xf32, #tpu.memory_space<smem>>, %arg4: memref<8x128xf32, #tpu.memory_space<vmem>>) attributes {dimension_semantics = [#tpu.dimension_semantics<arbitrary>], iteration_bounds = array<i64: 1>, scalar_prefetch = 0 : i64, scratch_operands = 1 : i64, tpu.core_type = #tpu.core_type<tc>, window_params = [{transform_indices = @transform_0, window_bounds = array<i64: 2048, 128>}, {transform_indices = @transform_1, window_bounds = array<i64: 2048, 128>}, {transform_indices = @transform_2, window_bounds = array<i64: 1, 1>}]} {
    %c0_i32 = arith.constant 0 : i32
    %0 = arith.cmpi eq, %arg0, %c0_i32 : i32
    %1 = arith.extui %0 : i1 to i32
    %c0_i32_0 = arith.constant 0 : i32
    %2 = arith.cmpi ne, %1, %c0_i32_0 : i32
    scf.if %2 {
      %cst_9 = arith.constant 0.000000e+00 : f32
      %21 = vector.broadcast %cst_9 : f32 to vector<8x128xf32>
      %c0_10 = arith.constant 0 : index
      %c0_11 = arith.constant 0 : index
      %22 = vector.load %arg4[%c0_10, %c0_11] : memref<8x128xf32, #tpu.memory_space<vmem>>, vector<8x128xf32>
      tpu.vector_store %arg4[%c0_10, %c0_11], %21 {strides = array<i32>} : memref<8x128xf32, #tpu.memory_space<vmem>>, vector<8x128xf32>,
    } else {
    }
    %c0 = arith.constant 0 : index
    %c0_1 = arith.constant 0 : index
    %3 = vector.load %arg1[%c0, %c0_1] : memref<2048x128xf32, #tpu.memory_space<vmem>>, vector<2048x128xf32>
    %c0_2 = arith.constant 0 : index
    %c0_3 = arith.constant 0 : index
    %4 = vector.load %arg2[%c0_2, %c0_3] : memref<2048x128xf32, #tpu.memory_space<vmem>>, vector<2048x128xf32>
    %cst = arith.constant 0.000000e+00 : f32
    %5 = vector.broadcast %cst : f32 to vector<2048x128xf32>
    %6 = arith.maximumf %3, %5 : vector<2048x128xf32>
    %7 = arith.mulf %3, %4 : vector<2048x128xf32>
    %8 = arith.subf %6, %7 : vector<2048x128xf32>
    %9 = math.absf %3 : vector<2048x128xf32>
    %cst_4 = arith.constant 0.000000e+00 : f32
    %10 = vector.broadcast %cst_4 : f32 to vector<2048x128xf32>
    %11 = arith.subf %10, %9 : vector<2048x128xf32>
    %12 = math.exp %11 : vector<2048x128xf32>
    %13 = math.log1p %12 : vector<2048x128xf32>
    %14 = arith.addf %8, %13 : vector<2048x128xf32>
    %c0_i32_5 = arith.constant 0 : i32
    %15 = arith.cmpi slt, %arg0, %c0_i32_5 : i32
    %16 = arith.extui %15 : i1 to i32
    %c0_i32_6 = arith.constant 0 : i32
    %17 = arith.cmpi ne, %16, %c0_i32_6 : i32
    scf.if %17 {
      %c0_9 = arith.constant 0 : index
      %c0_10 = arith.constant 0 : index
      %21 = vector.load %arg4[%c0_9, %c0_10] : memref<8x128xf32, #tpu.memory_space<vmem>>, vector<8x128xf32>
      %22 = vector.shape_cast %14 : vector<2048x128xf32> to vector<256x8x128xf32>
      %cst_11 = arith.constant dense<0.000000e+00> : vector<8x128xf32>
      %23 = vector.multi_reduction <add>, %22, %cst_11 [0] : vector<256x8x128xf32> to vector<8x128xf32>
      %24 = arith.addf %21, %23 : vector<8x128xf32>
      %c0_12 = arith.constant 0 : index
      %c0_13 = arith.constant 0 : index
      %25 = vector.load %arg4[%c0_12, %c0_13] : memref<8x128xf32, #tpu.memory_space<vmem>>, vector<8x128xf32>
      tpu.vector_store %arg4[%c0_12, %c0_13], %24 {strides = array<i32>} : memref<8x128xf32, #tpu.memory_space<vmem>>, vector<8x128xf32>,
    } else {
    }
    %c0_i32_7 = arith.constant 0 : i32
    %18 = arith.cmpi eq, %arg0, %c0_i32_7 : i32
    %19 = arith.extui %18 : i1 to i32
    %c0_i32_8 = arith.constant 0 : i32
    %20 = arith.cmpi ne, %19, %c0_i32_8 : i32
    scf.if %20 {
      %c2048_i32 = arith.constant 2048 : i32
      %21 = arith.muli %arg0, %c2048_i32 : i32
      %c16_i32 = arith.constant 16 : i32
      %22 = arith.subi %c16_i32, %21 : i32
      %23 = tpu.iota {dimensions = array<i32: 0>} : vector<2048x128xi32>
      %24 = vector.broadcast %22 : i32 to vector<2048x128xi32>
      %25 = arith.cmpi slt, %23, %24 : vector<2048x128xi32>
      %cst_9 = arith.constant 0.000000e+00 : f32
      %26 = vector.broadcast %cst_9 : f32 to vector<2048x128xf32>
      %27 = arith.select %25, %14, %26 : vector<2048x128xi1>, vector<2048x128xf32>
      %c0_10 = arith.constant 0 : index
      %c0_11 = arith.constant 0 : index
      %28 = vector.load %arg4[%c0_10, %c0_11] : memref<8x128xf32, #tpu.memory_space<vmem>>, vector<8x128xf32>
      %29 = vector.shape_cast %27 : vector<2048x128xf32> to vector<256x8x128xf32>
      %cst_12 = arith.constant dense<0.000000e+00> : vector<8x128xf32>
      %30 = vector.multi_reduction <add>, %29, %cst_12 [0] : vector<256x8x128xf32> to vector<8x128xf32>
      %31 = arith.addf %28, %30 : vector<8x128xf32>
      %c0_13 = arith.constant 0 : index
      %c0_14 = arith.constant 0 : index
      %32 = vector.load %arg4[%c0_13, %c0_14] : memref<8x128xf32, #tpu.memory_space<vmem>>, vector<8x128xf32>
      tpu.vector_store %arg4[%c0_13, %c0_14], %31 {strides = array<i32>} : memref<8x128xf32, #tpu.memory_space<vmem>>, vector<8x128xf32>,
      %c0_15 = arith.constant 0 : index
      %c0_16 = arith.constant 0 : index
      %33 = vector.load %arg4[%c0_15, %c0_16] : memref<8x128xf32, #tpu.memory_space<vmem>>, vector<8x128xf32>
      %34 = vector.shape_cast %33 : vector<8x128xf32> to vector<1x8x128xf32>
      %cst_17 = arith.constant dense<0.000000e+00> : vector<1xf32>
      %35 = vector.multi_reduction <add>, %34, %cst_17 [1, 2] : vector<1x8x128xf32> to vector<1xf32>
      %36 = vector.shape_cast %35 : vector<1xf32> to vector<1x1x1xf32>
      %37 = vector.extract %36[0, 0, 0] : f32 from vector<1x1x1xf32>
      %c0_18 = arith.constant 0 : index
      %c0_19 = arith.constant 0 : index
      %38 = memref.load %arg3[%c0_18, %c0_19] : memref<1x1xf32, #tpu.memory_space<smem>>
      memref.store %37, %arg3[%c0_18, %c0_19] : memref<1x1xf32, #tpu.memory_space<smem>>
    } else {
    }
    return
  }
  func.func @transform_0(%arg0: i32) -> (i32, i32) {
    %c0_i32 = arith.constant 0 : i32
    %c0_i32_0 = arith.constant 0 : i32
    return %arg0, %c0_i32 : i32, i32
  }
  func.func @transform_1(%arg0: i32) -> (i32, i32) {
    %c0_i32 = arith.constant 0 : i32
    %c0_i32_0 = arith.constant 0 : i32
    return %arg0, %c0_i32 : i32, i32
  }
  func.func @transform_2(%arg0: i32) -> (i32, i32) {
    %c0_i32 = arith.constant 0 : i32
    %c0_i32_0 = arith.constant 0 : i32
    %c0_i32_1 = arith.constant 0 : i32
    return %c0_i32, %c0_i32_0 : i32, i32
  }
}

</mosaic_0001>

<bundles_post_ra>
// kernel: tpu_custom_call.1
= control target key start
LH: loop header
LB: loop body
LE: loop exit
PB: predicated region body
PF: predicated region fallthrough
CT: control target
= control target key end

     0   :  { %7 = vsyncpa [#allocation4], 0  ;;  %s6329_s0 = inlined_call_operand.hbm [shape: f32[16,128], index: 0, kind: input, shape index: {}]   ;;  %s6330_s1 = inlined_call_operand.hbm [shape: f32[16,128], index: 1, kind: input, shape index: {}]   ;;  %s6331_s2 = inlined_call_operand.hbm [shape: f32[1,1], index: 2, kind: output, shape index: {}]  }
   0x1   :  { %8 = vsyncpa [#allocation7], 0 }
   0x2   :  { %9 = vsyncpa [#allocation5], 0 }
   0x3   :  { %14 = vsyncadd [#allocation4], 32512  ;;  %s6300_s9 = smov [#allocation3]  }
   0x4   :  { %s15_s10 = sshll.u32 %s6300_s9, 4  ;;  %s16_s10 = int_to_ptr.vmem [resolvable:$true] %s15_s10 }
   0x5   :  { %s6254_s11 = scalar_lea.vmem %s16_s10, 256  ;;  %s6258_s12 = scalar_lea.vmem %s16_s10, 32768 }
   0x6   :  { %p6255_p0 = scmp.ne.s32.totalorder %s16_s10, %s6254_s11  ;;  %p6259_p1 = scmp.lt.s32.totalorder %s16_s10, %s16_s10 }
   0x7   :  { %p6260_p2 = scmp.lt.s32.totalorder %s6258_s12, %s6254_s11 }
   0x9   :  { %p6261_p3 = por %p6260_p2, %p6259_p1 }
   0xb   :  { %p6262_p4 = pnand %p6261_p3, %p6255_p0 }
   0xd   :  { %6265 = shalt.err (!%p6262_p4)
}
   0xe   :  { %s6301_s13 = smov 128   ;;  %s6302_s14 = smov 8  }
   0xf   :  { %21 = dma.hbm_to_vmem [thread:$0]  %s6329_s0, 256, %s16_s10, [#allocation4], %s6301_s13, %s6301_s13, %s6302_s14  }
  0x10   :  { %26 = vsyncadd [#allocation7], 32512  ;;  %s6303_s17 = smov [#allocation6]  }
  0x11   :  { %s27_s18 = sshll.u32 %s6303_s17, 4  ;;  %s28_s18 = int_to_ptr.vmem [resolvable:$true] %s27_s18 }
  0x12   :  { %s6274_s19 = scalar_lea.vmem %s28_s18, 256  ;;  %s6278_s20 = scalar_lea.vmem %s28_s18, 32768 }
  0x13   :  { %p6275_p5 = scmp.ne.s32.totalorder %s28_s18, %s6274_s19  ;;  %p6279_p6 = scmp.lt.s32.totalorder %s28_s18, %s28_s18 }
  0x14   :  { %p6280_p7 = scmp.lt.s32.totalorder %s6278_s20, %s6274_s19 }
  0x16   :  { %p6281_p8 = por %p6280_p7, %p6279_p6 }
  0x18   :  { %p6282_p9 = pnand %p6281_p8, %p6275_p5 }
  0x1a   :  { %6285 = shalt.err (!%p6282_p9)
}
  0x1b   :  { %33 = dma.hbm_to_vmem [thread:$0]  %s6330_s1, 256, %s28_s18, [#allocation7], %s6301_s13, %s6301_s13, %s6302_s14  }
  0x1c   :  { %6294 = dma.done.wait [#allocation4], 32768  }
  0x1d   :  { %6295 = vsyncadd [#allocation4], 4294934528 }
  0x1e   :  { %6296 = dma.done.wait [#allocation7], 32768  }
  0x1f   :  { %6297 = vsyncadd [#allocation7], 4294934528  ;;  %v45_v0 = vld [vmem:[#allocation3] sm:$0xff]  ;;  %v46_v1 = vld [vmem:[#allocation3 + $0x8] sm:$0xff]  ;;  %s6304_s1 = smov [#allocation8]  }
  0x20   :  { %v1325_v2 = vand.u32 2147483647, %v45_v0  ;;  %v1326_v3 = vand.u32 2147483647, %v46_v1  ;;  %v301_v14 = vld [vmem:[#allocation6] sm:$0xff]  ;;  %v302_v15 = vld [vmem:[#allocation6 + $0x8] sm:$0xff] }
  0x21   :  { %v557_v17 = vmax.f32 %v45_v0, 0.0  ;;  %v813_v18 = vmul.f32 %v301_v14, %v45_v0  ;;  %v558_v21 = vmax.f32 %v46_v1, 0.0  ;;  %v814_v22 = vmul.f32 %v302_v15, %v46_v1 }
  0x22   :  { %v1581_v4 = vsub.f32 0.0, %v1325_v2  ;;  %v1582_v5 = vsub.f32 0.0, %v1326_v3 }
  0x23   :  { %v1069_v26 = vsub.f32 %v557_v17, %v813_v18  ;;  %v1070_v29 = vsub.f32 %v558_v21, %v814_v22 }
  0x24   :  { %v1837_v6 = vmul.f32 1.442695, %v1581_v4  ;;  %v1839_v7 = vmul.f32 1.442695, %v1582_v5 }
  0x26   :  { %6238 = vpow2.f32 %v1837_v6 }
  0x27   :  { %6240 = vpow2.f32 %v1839_v7 }
  0x33   :  { %v6239_v8 = vpop.eup %6238 }
  0x34   :  { %v6241_v9 = vpop.eup %6240  ;;  %v2349_v10 = vadd.f32 1.0, %v6239_v8  ;;  %v2352_v12 = vmul.f32 -0.5, %v6239_v8  ;;  %v2355_v19 = vand.u32 2147483647, %v6239_v8 }
  0x35   :  { %v2358_v11 = vadd.f32 1.0, %v6241_v9  ;;  %v2361_v13 = vmul.f32 -0.5, %v6241_v9  ;;  %v2364_v23 = vand.u32 2147483647, %v6241_v9 }
  0x36   :  { %6242 = vlog2.f32 %v2349_v10  ;;  %v2353_v16 = vadd.f32 1.0, %v2352_v12  ;;  %vm2356_vm0 = vcmp.lt.f32.partialorder %v2355_v19, 0.0004427343 }
  0x37   :  { %6244 = vlog2.f32 %v2358_v11  ;;  %v2362_v20 = vadd.f32 1.0, %v2361_v13  ;;  %vm2365_vm1 = vcmp.lt.f32.partialorder %v2364_v23, 0.0004427343 }
  0x38   :  { %v2354_v24 = vmul.f32 %v6239_v8, %v2353_v16 }
  0x39   :  { %v2363_v27 = vmul.f32 %v6241_v9, %v2362_v20 }
  0x43   :  { %v6243_v25 = vpop.eup %6242 }
  0x44   :  { %v6245_v28 = vpop.eup %6244  ;;  %v2351_v30 = vmul.f32 0.6931472, %v6243_v25 }
  0x45   :  { %v2360_v31 = vmul.f32 0.6931472, %v6245_v28 }
  0x46   :  { %v2357_v32 = vsel %vm2356_vm0, %v2354_v24, %v2351_v30 }
  0x47   :  { %v2366_v33 = vsel %vm2365_vm1, %v2363_v27, %v2360_v31  ;;  %v4653_v34 = vadd.f32 %v2357_v32, %v1069_v26 }
  0x48   :  { %v4654_v35 = vadd.f32 %v2366_v33, %v1070_v29 }
  0x4a   :  { %v5947_v36 = vadd.f32 %v4654_v35, %v4653_v34 }
  0x4c   :  { %6205 = vadd.xlane.f32.xlu0 %v5947_v36 }
  0xd5   :  { %v6206_v37 = vpop.xlane.xlu0 %6205 }
  0xd6   :  { %v6207_v38 = vrot.slane %v6206_v37, 4 }
  0xd8   :  { %v6208_v39 = vadd.f32 %v6207_v38, %v6206_v37 }
  0xda   :  { %v6209_v40 = vrot.slane %v6208_v39, 2 }
  0xdc   :  { %v6210_v41 = vadd.f32 %v6209_v40, %v6208_v39 }
  0xde   :  { %v6211_v42 = vrot.slane %v6210_v41, 1 }
  0xe0   :  { %v6212_v43 = vadd.f32 %v6211_v42, %v6210_v41 }
  0xe2   :  { %6231 = vpush %v6212_v43 }
 0x113   :  { %s6232_s0 = spop %6231 }
 0x114   :  { %6215 = sst [smem:[#allocation8]] %s6232_s0 }
 0x115   :  { %6223 = dma.smem_to_hbm %s6304_s1, 16, %s6331_s2, [#allocation5]  }
 0x116   :  { %6298 = dma.done.wait [#allocation5], 16  }
 0x117   :  { %6299 = vsyncadd [#allocation5], 4294967280 }
 0x118   :  { %6227 = sfence }
 0x119   :  { %6228 = vsyncpa [#allocation4], 1 }
 0x11a   :  { %6229 = vsyncpa [#allocation7], 1 }
 0x11b   :  { %6230 = vsyncpa [#allocation5], 1 }

</bundles_post_ra>
